<compile_context>
chip_gen: v7x
topology: tpu7x:2x2x1
jax: 0.10.0
libtpu: 0.0.40
codegen_flags: <defaults>
</compile_context>

<pallas_src>
import math
import functools

import jax
import jax.numpy as jnp
from jax import lax
from jax.experimental import pallas as pl
from jax.experimental.pallas import tpu as pltpu


def _round_up(n, m):
    return ((n + m - 1) // m) * m


def _prenorm_residual_ffn_kernel(x_ref, g_ref, b_ref, w1_ref, b1_ref, w2_ref, b2_ref,
                                 o_ref, *, eps):
    # Token tile in f32 for the norm / residual numerics.
    x = x_ref[...].astype(jnp.float32)                          # (tm, D)

    # ---- LayerNorm over last axis (biased variance, like torch.nn.LayerNorm) ----
    mean = jnp.mean(x, axis=-1, keepdims=True)
    xc = x - mean
    var = jnp.mean(xc * xc, axis=-1, keepdims=True)
    xn = xc * lax.rsqrt(var + eps)
    xn = xn * g_ref[...] + b_ref[...]                           # gamma/beta in f32

    # ---- fn: Linear -> GELU (tanh approx -> EUP, not VALU) -> Linear ----
    # bf16 operands on the MXU, f32 accumulation; elementwise math in f32.
    h = jnp.dot(xn.astype(w1_ref.dtype), w1_ref[...],
                preferred_element_type=jnp.float32) + b1_ref[...]
    h = jax.nn.gelu(h, approximate=True)
    y = jnp.dot(h.astype(w2_ref.dtype), w2_ref[...],
                preferred_element_type=jnp.float32) + b2_ref[...]

    # ---- residual ----
    o_ref[...] = (y + x).astype(o_ref.dtype)


def _pick_token_tile(D, H, x_bytes, w_bytes, budget_bytes):
    """Largest token tile (multiple of 8, <= 2048) whose VMEM footprint fits budget."""
    per_tok = (2 * 2 * D * x_bytes      # x + out tiles, double-buffered
               + 2 * D * 4              # f32 x / xn temporaries
               + H * 4)                 # f32 hidden intermediate
    fixed = (4 * D * H * w_bytes        # W1 + W2, double-buffered
             + 4 * (2 * D + H) * 4      # gamma/beta/b1/b2 (tiny)
             + (2 << 20))               # slack for compiler scratch
    avail = max(budget_bytes - fixed, per_tok * 8)
    return max(8, min(2048, (avail // per_tok) // 8 * 8))


def _vmem_limit_bytes(tm, D, H, x_bytes, w_bytes):
    need = (2 * 2 * tm * D * x_bytes    # x + out tiles, double-buffered
            + 4 * D * H * w_bytes       # W1 + W2, double-buffered
            + tm * H * 4                # f32 hidden intermediate
            + 3 * tm * D * 4            # f32 temporaries (x, xn, y)
            + (8 << 20))                # headroom for compiler scratch / spill
    # Clamp: >= v6e default scoped limit, <= 48 MiB so v7x (64 MiB physical per TC)
    # keeps headroom; v5e/v6e have 128 MiB physical so the cap is always safe.
    return int(min(max(need, 32 << 20), 48 << 20))


def prenorm_residual(x, gamma, beta, w1, b1, w2, b2, *, eps=1e-5, tm=2048):
    """x: (T, D) f32 or bf16. gamma/beta: (1, D) f32. w1: (D, H) bf16, b1: (1, H) f32,
    w2: (H, D) bf16, b2: (1, D) f32. Returns (T, D) in x.dtype.
    D should be a multiple of 128 for lane-dense loads/stores."""
    T, D = x.shape
    H = w1.shape[1]
    x_bytes = x.dtype.itemsize
    w_bytes = w1.dtype.itemsize

    # Token tile: as large as the VMEM budget allows, but capped at ceil(T/2) so the
    # "parallel" grid has >= 2 steps (both v7x TensorCores busy); always a multiple of 8.
    tm_budget = _pick_token_tile(D, H, x_bytes, w_bytes, budget_bytes=40 << 20)
    two_core_cap = _round_up(pl.cdiv(T, 2), 8) if T > 8 else 8
    tm_eff = max(8, min(tm, tm_budget, two_core_cap))

    grid = (pl.cdiv(T, tm_eff),)   # partial tail block handled by Pallas masking
    kernel = functools.partial(_prenorm_residual_ffn_kernel, eps=eps)

    cost = pl.CostEstimate(
        flops=4 * T * D * H,                                   # two matmuls
        transcendentals=T * H,                                 # tanh per hidden element
        bytes_accessed=2 * T * D * x_bytes + 2 * D * H * w_bytes + (2 * D + H) * 4,
    )

    return pl.pallas_call(
        kernel,
        out_shape=jax.ShapeDtypeStruct((T, D), x.dtype),
        grid_spec=pl.GridSpec(
            grid=grid,
            in_specs=[
                pl.BlockSpec((tm_eff, D), lambda i: (i, 0)),   # x tile (pipelined)
                pl.BlockSpec((1, D), lambda i: (0, 0)),        # layernorm gamma (resident)
                pl.BlockSpec((1, D), lambda i: (0, 0)),        # layernorm beta
                pl.BlockSpec((D, H), lambda i: (0, 0)),        # fn: W1 (bf16, resident)
                pl.BlockSpec((1, H), lambda i: (0, 0)),        # fn: b1
                pl.BlockSpec((H, D), lambda i: (0, 0)),        # fn: W2 (bf16, resident)
                pl.BlockSpec((1, D), lambda i: (0, 0)),        # fn: b2
            ],
            out_specs=pl.BlockSpec((tm_eff, D), lambda i: (i, 0)),
        ),
        compiler_params=pltpu.CompilerParams(
            dimension_semantics=("parallel",),                 # token tiles split across TCs
            vmem_limit_bytes=_vmem_limit_bytes(tm_eff, D, H, x_bytes, w_bytes),
        ),
        cost_estimate=cost,
    )(x, gamma, beta, w1, b1, w2, b2)


def _reference(x, gamma, beta, w1, b1, w2, b2, eps=1e-5):
    # Precision-matched pure-JAX reference: f32 norm, tanh-approx GELU in f32,
    # bf16 matmul operands, f32 accumulation, f32 residual.
    xf = x.astype(jnp.float32)
    mean = jnp.mean(xf, axis=-1, keepdims=True)
    var = jnp.mean((xf - mean) ** 2, axis=-1, keepdims=True)
    xn = (xf - mean) * lax.rsqrt(var + eps) * gamma + beta
    h = jnp.dot(xn.astype(w1.dtype), w1, preferred_element_type=jnp.float32) + b1
    h = jax.nn.gelu(h, approximate=True)
    y = jnp.dot(h.astype(w2.dtype), w2, preferred_element_type=jnp.float32) + b2
    return (y + xf).astype(x.dtype)


if __name__ == "__main__":
    # Small shapes consistent with the module: batch=2, seq=8, dim=128, hidden=256.
    # dim is a multiple of 128 so loads/stores stay lane-dense.
    batch, seq, dim, hidden = 2, 8, 128, 256
    key = jax.random.PRNGKey(0)
    kx, kw1, kb1, kw2, kb2, kx2 = jax.random.split(key, 6)

    x = jax.random.normal(kx, (batch, seq, dim), dtype=jnp.float32)

    # LayerNorm params (PyTorch default init: weight=1, bias=0), kept in f32.
    gamma = jnp.ones((1, dim), dtype=jnp.float32)
    beta = jnp.zeros((1, dim), dtype=jnp.float32)

    # fn = Linear(dim, hidden) -> GELU -> Linear(hidden, dim); weights in bf16 (MXU path).
    w1 = (jax.random.normal(kw1, (dim, hidden), dtype=jnp.float32)
          * (1.0 / math.sqrt(dim))).astype(jnp.bfloat16)
    b1 = jax.random.normal(kb1, (1, hidden), dtype=jnp.float32) * 0.01
    w2 = (jax.random.normal(kw2, (hidden, dim), dtype=jnp.float32)
          * (1.0 / math.sqrt(hidden))).astype(jnp.bfloat16)
    b2 = jax.random.normal(kb2, (1, dim), dtype=jnp.float32) * 0.01

    # ---- case 1: module-shaped input (batch, seq, dim) -> flatten tokens ----
    x2d = x.reshape(batch * seq, dim)
    out2d = prenorm_residual(x2d, gamma, beta, w1, b1, w2, b2)
    out = out2d.reshape(batch, seq, dim)
    jax.block_until_ready(out)
    ref = _reference(x2d, gamma, beta, w1, b1, w2, b2).reshape(batch, seq, dim)
    assert jnp.allclose(out, ref, atol=5e-3, rtol=5e-3), "mismatch vs. reference (case 1)"

    # ---- case 2: ragged token count (partial tail block, multi-step grid, no pad copy) ----
    T2 = 300
    xb = jax.random.normal(kx2, (T2, dim), dtype=jnp.float32)
    outb = prenorm_residual(xb, gamma, beta, w1, b1, w2, b2)
    jax.block_until_ready(outb)
    refb = _reference(xb, gamma, beta, w1, b1, w2, b2)
    assert outb.shape == (T2, dim)
    assert jnp.allclose(outb, refb, atol=5e-3, rtol=5e-3), "mismatch vs. reference (case 2)"

    # ---- case 3: bf16 activations at the HBM boundary (mem-bound v5e/v6e path) ----
    xc = xb.astype(jnp.bfloat16)
    outc = prenorm_residual(xc, gamma, beta, w1, b1, w2, b2)
    jax.block_until_ready(outc)
    refc = _reference(xc, gamma, beta, w1, b1, w2, b2)
    assert outc.dtype == jnp.bfloat16
    assert jnp.allclose(outc.astype(jnp.float32), refc.astype(jnp.float32),
                        atol=3e-2, rtol=3e-2), "mismatch vs. reference (case 3)"

    print("KERNEL_OK")
</pallas_src>

<mosaic_0001>
module attributes {stable_mosaic.version = 11 : i64} {
  func.func @_prenorm_residual_ffn_kernel(%arg0: i32, %arg1: memref<8x128xf32, #tpu.memory_space<vmem>>, %arg2: memref<1x128xf32, #tpu.memory_space<vmem>>, %arg3: memref<1x128xf32, #tpu.memory_space<vmem>>, %arg4: memref<128x256xbf16, #tpu.memory_space<vmem>>, %arg5: memref<1x256xf32, #tpu.memory_space<vmem>>, %arg6: memref<256x128xbf16, #tpu.memory_space<vmem>>, %arg7: memref<1x128xf32, #tpu.memory_space<vmem>>, %arg8: memref<8x128xf32, #tpu.memory_space<vmem>>) attributes {dimension_semantics = [#tpu.dimension_semantics<parallel>], iteration_bounds = array<i64: 2>, scalar_prefetch = 0 : i64, scratch_operands = 0 : i64, tpu.core_type = #tpu.core_type<tc>, window_params = [{transform_indices = @transform_0, window_bounds = array<i64: 8, 128>}, {pipeline_mode = #tpu.pipeline_mode<synchronous>, transform_indices = @transform_1, window_bounds = array<i64: 1, 128>}, {pipeline_mode = #tpu.pipeline_mode<synchronous>, transform_indices = @transform_2, window_bounds = array<i64: 1, 128>}, {pipeline_mode = #tpu.pipeline_mode<synchronous>, transform_indices = @transform_3, window_bounds = array<i64: 128, 256>}, {pipeline_mode = #tpu.pipeline_mode<synchronous>, transform_indices = @transform_4, window_bounds = array<i64: 1, 256>}, {pipeline_mode = #tpu.pipeline_mode<synchronous>, transform_indices = @transform_5, window_bounds = array<i64: 256, 128>}, {pipeline_mode = #tpu.pipeline_mode<synchronous>, transform_indices = @transform_6, window_bounds = array<i64: 1, 128>}, {transform_indices = @transform_7, window_bounds = array<i64: 8, 128>}]} {
    %c0 = arith.constant 0 : index
    %c0_0 = arith.constant 0 : index
    %0 = vector.load %arg1[%c0, %c0_0] : memref<8x128xf32, #tpu.memory_space<vmem>>, vector<8x128xf32>
    %cst = arith.constant dense<0.000000e+00> : vector<8xf32>
    %1 = vector.multi_reduction <add>, %0, %cst [1] : vector<8x128xf32> to vector<8xf32>
    %2 = vector.shape_cast %1 : vector<8xf32> to vector<8x1xf32>
    %cst_1 = arith.constant 1.280000e+02 : f32
    %3 = vector.broadcast %cst_1 : f32 to vector<8x1xf32>
    %4 = arith.divf %2, %3 : vector<8x1xf32>
    %5 = vector.broadcast %4 : vector<8x1xf32> to vector<8x128xf32>
    %6 = arith.subf %0, %5 : vector<8x128xf32>
    %7 = arith.mulf %6, %6 : vector<8x128xf32>
    %cst_2 = arith.constant dense<0.000000e+00> : vector<8xf32>
    %8 = vector.multi_reduction <add>, %7, %cst_2 [1] : vector<8x128xf32> to vector<8xf32>
    %9 = vector.shape_cast %8 : vector<8xf32> to vector<8x1xf32>
    %cst_3 = arith.constant 1.280000e+02 : f32
    %10 = vector.broadcast %cst_3 : f32 to vector<8x1xf32>
    %11 = arith.divf %9, %10 : vector<8x1xf32>
    %cst_4 = arith.constant 9.99999974E-6 : f32
    %12 = vector.broadcast %cst_4 : f32 to vector<8x1xf32>
    %13 = arith.addf %11, %12 : vector<8x1xf32>
    %14 = math.rsqrt %13 : vector<8x1xf32>
    %15 = vector.broadcast %14 : vector<8x1xf32> to vector<8x128xf32>
    %16 = arith.mulf %6, %15 : vector<8x128xf32>
    %c0_5 = arith.constant 0 : index
    %c0_6 = arith.constant 0 : index
    %17 = vector.load %arg2[%c0_5, %c0_6] : memref<1x128xf32, #tpu.memory_space<vmem>>, vector<1x128xf32>
    %18 = vector.broadcast %17 : vector<1x128xf32> to vector<8x128xf32>
    %19 = arith.mulf %16, %18 : vector<8x128xf32>
    %c0_7 = arith.constant 0 : index
    %c0_8 = arith.constant 0 : index
    %20 = vector.load %arg3[%c0_7, %c0_8] : memref<1x128xf32, #tpu.memory_space<vmem>>, vector<1x128xf32>
    %21 = vector.broadcast %20 : vector<1x128xf32> to vector<8x128xf32>
    %22 = arith.addf %19, %21 : vector<8x128xf32>
    %23 = arith.truncf %22 : vector<8x128xf32> to vector<8x128xbf16>
    %c0_9 = arith.constant 0 : index
    %c0_10 = arith.constant 0 : index
    %24 = vector.load %arg4[%c0_9, %c0_10] : memref<128x256xbf16, #tpu.memory_space<vmem>>, vector<128x256xbf16>
    %cst_11 = arith.constant dense<0.000000e+00> : vector<8x256xf32>
    %25 = tpu.matmul %23, %24, %cst_11 {dimension_numbers = #tpu.dot_dimension_numbers<[1], [0], [0], [1], [0, 0, 1, 1], [], []>} : vector<8x128xbf16>, vector<128x256xbf16>, vector<8x256xf32> -> vector<8x256xf32>
    %c0_12 = arith.constant 0 : index
    %c0_13 = arith.constant 0 : index
    %26 = vector.load %arg5[%c0_12, %c0_13] : memref<1x256xf32, #tpu.memory_space<vmem>>, vector<1x256xf32>
    %27 = vector.broadcast %26 : vector<1x256xf32> to vector<8x256xf32>
    %28 = arith.addf %25, %27 : vector<8x256xf32>
    %29 = arith.mulf %28, %28 : vector<8x256xf32>
    %30 = arith.mulf %28, %29 : vector<8x256xf32>
    %cst_14 = arith.constant 4.471500e-02 : f32
    %31 = vector.broadcast %cst_14 : f32 to vector<8x256xf32>
    %32 = arith.mulf %31, %30 : vector<8x256xf32>
    %33 = arith.addf %28, %32 : vector<8x256xf32>
    %cst_15 = arith.constant 0.797884583 : f32
    %34 = vector.broadcast %cst_15 : f32 to vector<8x256xf32>
    %35 = arith.mulf %34, %33 : vector<8x256xf32>
    %36 = math.tanh %35 : vector<8x256xf32>
    %cst_16 = arith.constant 1.000000e+00 : f32
    %37 = vector.broadcast %cst_16 : f32 to vector<8x256xf32>
    %38 = arith.addf %37, %36 : vector<8x256xf32>
    %cst_17 = arith.constant 5.000000e-01 : f32
    %39 = vector.broadcast %cst_17 : f32 to vector<8x256xf32>
    %40 = arith.mulf %39, %38 : vector<8x256xf32>
    %41 = arith.mulf %28, %40 : vector<8x256xf32>
    %42 = arith.truncf %41 : vector<8x256xf32> to vector<8x256xbf16>
    %c0_18 = arith.constant 0 : index
    %c0_19 = arith.constant 0 : index
    %43 = vector.load %arg6[%c0_18, %c0_19] : memref<256x128xbf16, #tpu.memory_space<vmem>>, vector<256x128xbf16>
    %cst_20 = arith.constant dense<0.000000e+00> : vector<8x128xf32>
    %44 = tpu.matmul %42, %43, %cst_20 {dimension_numbers = #tpu.dot_dimension_numbers<[1], [0], [0], [1], [0, 0, 1, 1], [], []>} : vector<8x256xbf16>, vector<256x128xbf16>, vector<8x128xf32> -> vector<8x128xf32>
    %c0_21 = arith.constant 0 : index
    %c0_22 = arith.constant 0 : index
    %45 = vector.load %arg7[%c0_21, %c0_22] : memref<1x128xf32, #tpu.memory_space<vmem>>, vector<1x128xf32>
    %46 = vector.broadcast %45 : vector<1x128xf32> to vector<8x128xf32>
    %47 = arith.addf %44, %46 : vector<8x128xf32>
    %48 = arith.addf %47, %0 : vector<8x128xf32>
    %c0_23 = arith.constant 0 : index
    %c0_24 = arith.constant 0 : index
    %49 = vector.load %arg8[%c0_23, %c0_24] : memref<8x128xf32, #tpu.memory_space<vmem>>, vector<8x128xf32>
    tpu.vector_store %arg8[%c0_23, %c0_24], %48 {strides = array<i32>} : memref<8x128xf32, #tpu.memory_space<vmem>>, vector<8x128xf32>,
    return
  }
  func.func @transform_0(%arg0: i32) -> (i32, i32) {
    %c0_i32 = arith.constant 0 : i32
    %c0_i32_0 = arith.constant 0 : i32
    return %arg0, %c0_i32 : i32, i32
  }
  func.func @transform_1(%arg0: i32) -> (i32, i32) {
    %c0_i32 = arith.constant 0 : i32
    %c0_i32_0 = arith.constant 0 : i32
    %c0_i32_1 = arith.constant 0 : i32
    return %c0_i32, %c0_i32_0 : i32, i32
  }
  func.func @transform_2(%arg0: i32) -> (i32, i32) {
    %c0_i32 = arith.constant 0 : i32
    %c0_i32_0 = arith.constant 0 : i32
    %c0_i32_1 = arith.constant 0 : i32
    return %c0_i32, %c0_i32_0 : i32, i32
  }
  func.func @transform_3(%arg0: i32) -> (i32, i32) {
    %c0_i32 = arith.constant 0 : i32
    %c0_i32_0 = arith.constant 0 : i32
    %c0_i32_1 = arith.constant 0 : i32
    return %c0_i32, %c0_i32_0 : i32, i32
  }
  func.func @transform_4(%arg0: i32) -> (i32, i32) {
    %c0_i32 = arith.constant 0 : i32
    %c0_i32_0 = arith.constant 0 : i32
    %c0_i32_1 = arith.constant 0 : i32
    return %c0_i32, %c0_i32_0 : i32, i32
  }
  func.func @transform_5(%arg0: i32) -> (i32, i32) {
    %c0_i32 = arith.constant 0 : i32
    %c0_i32_0 = arith.constant 0 : i32
    %c0_i32_1 = arith.constant 0 : i32
    return %c0_i32, %c0_i32_0 : i32, i32
  }
  func.func @transform_6(%arg0: i32) -> (i32, i32) {
    %c0_i32 = arith.constant 0 : i32
    %c0_i32_0 = arith.constant 0 : i32
    %c0_i32_1 = arith.constant 0 : i32
    return %c0_i32, %c0_i32_0 : i32, i32
  }
  func.func @transform_7(%arg0: i32) -> (i32, i32) {
    %c0_i32 = arith.constant 0 : i32
    %c0_i32_0 = arith.constant 0 : i32
    return %arg0, %c0_i32 : i32, i32
  }
}

</mosaic_0001>

<bundles_post_ra>
// kernel: tpu_custom_call.1
= control target key start
LH: loop header
LB: loop body
LE: loop exit
PB: predicated region body
PF: predicated region fallthrough
CT: control target
= control target key end

     0   :  { %12 = vsyncpa [#allocation3], 0  ;;  %s1451_s0 = inlined_call_operand.hbm [shape: f32[16,128], index: 0, kind: input, shape index: {}]   ;;  %s1452_s1 = inlined_call_operand.vmem [shape: f32[1,128], index: 1, kind: input, shape index: {}]   ;;  %s1453_s2 = inlined_call_operand.vmem [shape: f32[1,128], index: 2, kind: input, shape index: {}]   ;;  %s1454_s3 = inlined_call_operand.hbm [shape: bf16[128,256], index: 3, kind: input, shape index: {}]   ;;  %s1455_s4 = inlined_call_operand.vmem [shape: f32[1,256], index: 4, kind: input, shape index: {}]   ;;  %s1456_s5 = inlined_call_operand.hbm [shape: bf16[256,128], index: 5, kind: input, shape index: {}]   ;;  %s1457_s6 = inlined_call_operand.vmem [shape: f32[1,128], index: 6, kind: input, shape index: {}]   ;;  %s1458_s7 = inlined_call_operand.hbm [shape: f32[16,128], index: 7, kind: output, shape index: {}]  }
   0x1   :  { %14 = vsyncpa [#allocation3 + $0x1], 0 }
   0x2   :  { %15 = vsyncpa [#allocation6], 0 }
   0x3   :  { %16 = vsyncpa [#allocation4], 0 }
   0x4   :  { %18 = vsyncpa [#allocation4 + $0x1], 0  ;;  %s1201_s24 = smov 0   ;;  %s1203_s25 = smov 0  }
   0x5   :  { %s1205_s26 = smov 0   ;;  %s1207_s27 = smov 0  }
   0x6 LB: > { %s1222_s28 = sadd.s32 4294967295, %s1150_s27   ;;  %s803_s29 = sadd.s32 4294967294, %s1150_s27   ;;  %s1150_s27 = sphi %s1207_s27, %s1478_s27   ;;  %s1146_s26 = sphi %s1205_s26, %s1477_s26   ;;  %s1142_s25 = sphi %s1203_s25, %s1476_s25   ;;  %s1138_s24 = sphi %s1201_s24, %s1475_s24  }
   0x7   : > { %p44_p0 = scmp.ne.s32.totalorder %s1142_s25, %s1138_s24  ;;  %p1459_p1 = scmp.eq.s32.totalorder %s1222_s28, 0 }
   0x8   : > { %p200_p3 = scmp.eq.s32.totalorder %s803_s29, 1  ;;  %p804_p5 = scmp.ge.s32.totalorder %s1150_s27, 1 }
   0x9   : > { %p1231_p4 = por %p1459_p1, %p44_p0  ;;  %p207_p7 = scmp.lt.s32.totalorder %s1150_s27, 3 }
   0xa   : > { %p1236_p6 = por %p200_p3, %p44_p0  ;;  %s1152_s10 = smov [#allocation5]  }
   0xb   : > { %s1462_s30 = scalar_select %p1231_p4, 1, 0 }
   0xc   : > { %s1463_s8 = scalar_select %p1236_p6, 1, 0 }
   0xd   : > { %p1241_p8 = pnand %p804_p5, %p207_p7  ;;  %s225_s11 = sshll.u32 %s1152_s10, 4  ;;  %s1245_s11 = int_to_ptr.vmem [resolvable:$true] %s225_s11 }
   0xe   : > { %s1153_s13 = smov [#allocation7]   ;;  %s994_s17 = scalar_lea.hbm %s1454_s3, 2048 }
   0xf   : > { %p888_p9 = pneg %p1241_p8  ;;  %s241_s14 = sshll.u32 %s1153_s13, 4  ;;  %s1256_s14 = int_to_ptr.vmem [resolvable:$true] %s241_s14 }
  0x10   : > { %p995_p12 = scmp.ne.s32.totalorder %s1454_s3, %s994_s17  ;;  %p1001_p5 = scmp.lt.u32.totalorder %s994_s17, %s1454_s3 }
  0x11   : > { %p1252_p11 = pnand %p888_p9, %p1459_p1 }
  0x13   : > { %p996_p13 = pneg %p1252_p11 }
  0x15   : > { %p997_p0 = pnand %p996_p13, %p995_p12 }
  0x17   : > { %p998_p3 = pneg %p997_p0 }
  0x19   : > { %p1003_p7 = pnand %p1001_p5, %p998_p3 }
  0x1b   : > { %1006 = shalt.err (!%p1003_p7)
}
  0x1c   : > { %s1007_s22 = scalar_lea.vmem %s1245_s11, 2048  ;;  %p1015_p2 = scmp.lt.s32.totalorder %s1245_s11, %s1245_s11 }
  0x1d   : > { %p1008_p9 = scmp.ne.s32.totalorder %s1245_s11, %s1007_s22  ;;  %p1016_p12 = scmp.lt.s32.totalorder %s1007_s22, %s1007_s22 }
  0x1f   : > { %p1010_p10 = pnand %p1008_p9, %p996_p13  ;;  %p1017_p0 = por %p1016_p12, %p1015_p2 }
  0x21   : > { %p1011_p1 = pneg %p1010_p10 }
  0x23   : > { %p1018_p6 = pnand %p1017_p0, %p1011_p1 }
  0x25   : > { %1021 = shalt.err (!%p1018_p6)
}
  0x26   : > { %s1154_s23 = smov 128   ;;  %s1155_s29 = smov 8  }
  0x27   : > { %891 = dma.hbm_to_vmem [thread:$0]  (!%p1252_p11), %s1454_s3, 2048, %s1245_s11, [#allocation6], %s1154_s23, %s1154_s23, %s1155_s29  }
  0x28   : > { %s1022_s17 = scalar_lea.hbm %s1456_s5, 2048 }
  0x29   : > { %p1023_p2 = scmp.ne.s32.totalorder %s1456_s5, %s1022_s17  ;;  %p1029_p10 = scmp.lt.u32.totalorder %s1022_s17, %s1456_s5 }
  0x2b   : > { %p1025_p1 = pnand %p1023_p2, %p996_p13 }
  0x2d   : > { %p1026_p6 = pneg %p1025_p1 }
  0x2f   : > { %p1031_p3 = pnand %p1029_p10, %p1026_p6 }
  0x31   : > { %1034 = shalt.err (!%p1031_p3)
}
  0x32   : > { %s1035_s11 = scalar_lea.vmem %s1256_s14, 2048  ;;  %p1043_p12 = scmp.lt.s32.totalorder %s1256_s14, %s1256_s14 }
  0x33   : > { %p1036_p5 = scmp.ne.s32.totalorder %s1256_s14, %s1035_s11  ;;  %p1044_p0 = scmp.lt.s32.totalorder %s1035_s11, %s1035_s11 }
  0x35   : > { %p1038_p7 = pnand %p1036_p5, %p996_p13  ;;  %p1045_p2 = por %p1044_p0, %p1043_p12 }
  0x37   : > { %p1039_p9 = pneg %p1038_p7 }
  0x39   : > { %p1046_p1 = pnand %p1045_p2, %p1039_p9 }
  0x3b   : > { %1049 = shalt.err (!%p1046_p1)
}
  0x3c   : > { %s1156_s22 = smov 64   ;;  %s1157_s23 = smov 4  }
  0x3d   : > { %894 = dma.hbm_to_vmem [thread:$0]  (!%p1252_p11), %s1456_s5, 2048, %s1256_s14, [#allocation6], %s1156_s22, %s1156_s22, %s1157_s23  }
  0x3e   : > { %s1311_s13 = sadd.s32 1, %s1150_s27   ;;  %s31_s16 = sadd.s32 1, %s1146_s26 }
  0x3f   : > { %s28_s15 = ssub.s32 %s1150_s27, %s1311_s13  ;;  %p38_p6 = scmp.ne.s32.totalorder %s1146_s26, %s1142_s25 }
  0x40   : > { %p29_p13 = scmp.eq.s32.totalorder %s28_s15, 0  ;;  %p39_p10 = scmp.eq.s32.totalorder %s1150_s27, 0 }
  0x41   : > { %p1466_p5 = scmp.eq.s32.totalorder %s1222_s28, 1  ;;  %p905_p9 = scmp.lt.s32.totalorder %s1150_s27, 2 }
  0x42   : > { %s1320_s17 = scalar_select %p29_p13, %s1146_s26, %s31_s16  }
  0x43   : > { %p40_p3 = por %p39_p10, %p38_p6  ;;  %p1324_p7 = por %p1466_p5, %p38_p6 }
  0x44   : > { %s258_s12 = sand.u32 1, %s1146_s26   ;;  %s809_s14 = sshll.u32 %s1150_s27, 7 }
  0x45   : > { %s1467_s18 = scalar_select %p1324_p7, 1, 0 }
  0x46   : > { %s808_s19 = sshll.u32 %s258_s12, 3  ;;  %s1334_s11 = scalar_lea.hbm %s1451_s0, %s809_s14 }
  0x47   : > { %s262_s22 = scalar_lea.vmem [#allocation2], %s808_s19  ;;  %p1338_p11 = pnand %p905_p9, %p40_p3 }
  0x48   : > { %s269_s23 = sshll.u32 %s262_s22, 4  ;;  %s259_s10 = scalar_lea.sflag [#allocation3], %s258_s12  ;;  %s1336_s23 = int_to_ptr.vmem [resolvable:$true] %s269_s23 }
  0x49   : > { %s1050_s15 = scalar_lea.hbm %s1334_s11, 128  ;;  %p1052_p0 = pneg %p1338_p11 }
  0x4a   : > { %p1051_p12 = scmp.ne.s32.totalorder %s1334_s11, %s1050_s15  ;;  %s1055_s14 = scalar_lea.hbm %s1451_s0, 256 }
  0x4b   : > { %p1056_p13 = scmp.lt.u32.totalorder %s1334_s11, %s1451_s0  ;;  %p1057_p6 = scmp.lt.u32.totalorder %s1055_s14, %s1050_s15 }
  0x4c   : > { %p1053_p2 = pnand %p1052_p0, %p1051_p12  ;;  %p1059_p3 = scmp.lt.u32.totalorder %s1050_s15, %s1334_s11 }
  0x4d   : > { %p1058_p10 = por %p1057_p6, %p1056_p13 }
  0x4e   : > { %p1054_p1 = pneg %p1053_p2 }
  0x4f   : > { %p1060_p5 = por %p1059_p3, %p1058_p10 }
  0x51   : > { %p1061_p9 = pnand %p1060_p5, %p1054_p1 }
  0x53   : > { %1064 = shalt.err (!%p1061_p9)
}
  0x54   : > { %s1065_s12 = scalar_lea.vmem %s1336_s23, 128  ;;  %s1158_s22 = smov [#allocation2]  }
  0x55   : > { %p1066_p12 = scmp.ne.s32.totalorder %s1336_s23, %s1065_s12  ;;  %s1070_s16 = sshll.u32 %s1158_s22, 4  ;;  %s1071_s16 = int_to_ptr.vmem [resolvable:$false] %s1070_s16 }
  0x56   : > { %s1072_s19 = scalar_lea.vmem %s1071_s16, 256  ;;  %p1073_p4 = scmp.lt.s32.totalorder %s1336_s23, %s1071_s16 }
  0x57   : > { %p1068_p2 = pnand %p1066_p12, %p1052_p0  ;;  %p1074_p13 = scmp.lt.s32.totalorder %s1072_s19, %s1065_s12 }
  0x59   : > { %p1069_p7 = pneg %p1068_p2  ;;  %p1075_p6 = por %p1074_p13, %p1073_p4 }
  0x5b   : > { %p1076_p10 = pnand %p1075_p6, %p1069_p7 }
  0x5d   : > { %1079 = shalt.err (!%p1076_p10)
}
  0x5e   : > { %898 = dma.hbm_to_vmem [thread:$0]  (!%p1338_p11), %s1334_s11, 128, %s1336_s23, %s259_s10  }
  0x5f   : > { %278 = sbr.rel (%p1241_p8) target bundleno = 898 (0x382), region = 48  ;;  %s1370_s15 = sand.u32 (!%p1241_p8), 1, %s1142_s25  }
  0x60   : > { %s811_s14 = sshll.u32 (!%p1241_p8), %s1370_s15, 3  ;;  %s281_s20 = scalar_lea.sflag (!%p1241_p8), [#allocation3], %s1370_s15 }
  0x61   : > { %s284_s21 = scalar_lea.vmem (!%p1241_p8), [#allocation2], %s811_s14  ;;  %p1469_p4 = scmp.ne.s32.totalorder (!%p1241_p8), %s1462_s30, 0 }
  0x66   : > { %1125 = dma.done.wait (%p1469_p4), %s281_s20, 128  }
  0x67   : > { %1127 = vsyncadd (%p1469_p4), %s281_s20, 4294967168  ;;  %p1470_p7 = scmp.eq.s32.totalorder %s1222_s28, 0 }
  0x69   : > { %1129 = dma.done.wait (%p1470_p7), [#allocation6], 4096   ;;  %p1471_p8 = pmov %p1470_p7 }
  0x6a   : > { %v1384_v0 = vld [vmem:[%s284_s21] sm:$0xff]  ;;  %v948_v1 = vld [vmem:[#allocation5 + $0x4] ss:$8 sps:$4 sm:$0xff]   ;;  %v950_v2 = vld [vmem:[#allocation5] ss:$8 sps:$4 sm:$0xff]   ;;  %v1159_v16 = vmov 0   ;;  %v372_v48 = vlaneseq }
  0x6b   : > { %1131 = vsyncadd (%p1471_p8), [#allocation6], 4294963200  ;;  %325 = vadd.xlane.f32.xlu0 %v1384_v0  ;;  %v951_v3 = vld [vmem:[#allocation5 + $0x14] ss:$8 sps:$4 sm:$0xff]   ;;  %462 = vmatprep.subr.bf16.mxu0 %v948_v1  ;;  %v953_v4 = vld [vmem:[#allocation5 + $0x10] ss:$8 sps:$4 sm:$0xff]  }
  0x6c   : > { %463 = vmatpush1.bf16.msra.mxu0 %v950_v2  ;;  %v954_v5 = vld [vmem:[#allocation5 + $0x24] ss:$8 sps:$4 sm:$0xff]   ;;  %v956_v10 = vld [vmem:[#allocation5 + $0x20] ss:$8 sps:$4 sm:$0xff]   ;;  %v957_v11 = vld [vmem:[#allocation5 + $0x34] ss:$8 sps:$4 sm:$0xff]   ;;  %494 = vmatprep.mubr.bf16.mxu0 %v1159_v16 }
  0x6d   : > { %464 = vmatprep.subr.bf16.mxu0 %v951_v3  ;;  %v959_v12 = vld [vmem:[#allocation5 + $0x30] ss:$8 sps:$4 sm:$0xff]   ;;  %v960_v13 = vld [vmem:[#allocation5 + $0x44] ss:$8 sps:$4 sm:$0xff]   ;;  %v962_v14 = vld [vmem:[#allocation5 + $0x40] ss:$8 sps:$4 sm:$0xff]  }
  0x6e   : > { %v963_v15 = vld [vmem:[#allocation5 + $0x54] ss:$8 sps:$4 sm:$0xff]   ;;  %v965_v17 = vld [vmem:[#allocation5 + $0x50] ss:$8 sps:$4 sm:$0xff]   ;;  %v966_v18 = vld [vmem:[#allocation5 + $0x64] ss:$8 sps:$4 sm:$0xff]  }
  0x6f   : > { %v968_v19 = vld [vmem:[#allocation5 + $0x60] ss:$8 sps:$4 sm:$0xff]   ;;  %v969_v20 = vld [vmem:[#allocation5 + $0x74] ss:$8 sps:$4 sm:$0xff]   ;;  %v971_v21 = vld [vmem:[#allocation5 + $0x70] ss:$8 sps:$4 sm:$0xff]  }
  0x70   : > { %465 = vmatpush1.bf16.msra.mxu0 %v953_v4  ;;  %v815_v26 = vld [vmem:[%s1452_s1] ss:$0 sm:$0xff]  ;;  %v972_v32 = vld [vmem:[#allocation7 + $0x40] sm:$0xff]   ;;  %v974_v34 = vld [vmem:[#allocation7 + $0x48] sm:$0xff]   ;;  %v373_v49 = vshrl.u32 %v372_v48, 7  ;;  %s851_s16 = sshll.u32 %s1222_s28, 7 }
  0x71   : > { %466 = vmatprep.subr.bf16.mxu0 %v954_v5  ;;  %v816_v28 = vld [vmem:[%s1453_s2] ss:$0 sm:$0xff]  ;;  %v973_v33 = vld [vmem:[#allocation7] sm:$0xff]   ;;  %854 = vmatprep.subr.bf16.mxu1 %v972_v32  ;;  %v975_v35 = vld [vmem:[#allocation7 + $0x8] sm:$0xff]   ;;  %s322_s19 = scalar_lea.vmem [#allocation8], %s811_s14  ;;  %s1407_s9 = scalar_lea.hbm %s1458_s7, %s851_s16 }
  0x72   : > { %855 = vmatpush3.bf16.msra.mxu1 %v973_v33  ;;  %v976_v36 = vld [vmem:[#allocation7 + $0x50] sm:$0xff]   ;;  %v978_v38 = vld [vmem:[#allocation7 + $0x58] sm:$0xff]   ;;  %v980_v40 = vld [vmem:[#allocation7 + $0x60] sm:$0xff]   ;;  %v374_v50 = vsub.s32 0, %v373_v49  ;;  %v378_v52 = vsub.s32 1, %v373_v49  ;;  %s714_s20 = sshll.u32 %s322_s19, 4  ;;  %s1409_s20 = int_to_ptr.vmem [resolvable:$true] %s714_s20 }
  0x73   : > { %856 = vmatprep.subr.bf16.mxu1 %v974_v34  ;;  %v977_v37 = vld [vmem:[#allocation7 + $0x10] sm:$0xff]   ;;  %v979_v39 = vld [vmem:[#allocation7 + $0x18] sm:$0xff]   ;;  %v981_v41 = vld [vmem:[#allocation7 + $0x20] sm:$0xff]   ;;  %s701_s11 = scalar_lea.sflag [#allocation4], %s1370_s15  ;;  %s1080_s23 = scalar_lea.vmem %s1409_s20, 128 }
  0x74   : > { %467 = vmatpush1.bf16.msra.mxu0 %v956_v10  ;;  %v982_v42 = vld [vmem:[#allocation7 + $0x68] sm:$0xff]   ;;  %v984_v44 = vld [vmem:[#allocation7 + $0x70] sm:$0xff]   ;;  %v986_v46 = vld [vmem:[#allocation7 + $0x78] sm:$0xff]   ;;  %p1081_p11 = scmp.ne.s32.totalorder %s1409_s20, %s1080_s23  ;;  %p1472_p0 = scmp.ne.s32.totalorder %s1467_s18, 0 }
  0x75   : > { %468 = vmatprep.subr.bf16.mxu0 %v957_v11  ;;  %v983_v43 = vld [vmem:[#allocation7 + $0x28] sm:$0xff]   ;;  %v985_v45 = vld [vmem:[#allocation7 + $0x30] sm:$0xff]   ;;  %v987_v47 = vld [vmem:[#allocation7 + $0x38] sm:$0xff]   ;;  %s1160_s28 = smov [#allocation8]  }
  0x76   : > { %857 = vmatpush3.bf16.msra.mxu1 %v975_v35  ;;  %v370_v51 = vld [vmem:[%s1455_s4] sm:$0x3]  ;;  %p1082_p1 = pnand %p1081_p11, %p1472_p0  ;;  %s1084_s14 = sshll.u32 %s1160_s28, 4  ;;  %s1085_s14 = int_to_ptr.vmem [resolvable:$false] %s1084_s14 }
  0x77   : > { %858 = vmatprep.subr.bf16.mxu1 %v976_v36  ;;  %v375_v53 = vrot.slane %v370_v51, %v374_v50  ;;  %v379_v54 = vrot.slane %v370_v51, %v378_v52  ;;  %s1086_s29 = scalar_lea.vmem %s1085_s14, 256  ;;  %p1087_p5 = scmp.lt.s32.totalorder %s1409_s20, %s1085_s14 }
  0x78   : > { %469 = vmatpush1.bf16.msra.mxu0 %v959_v12  ;;  %p1083_p3 = pneg %p1082_p1  ;;  %p1088_p9 = scmp.lt.s32.totalorder %s1086_s29, %s1080_s23 }
  0x79   : > { %470 = vmatprep.subr.bf16.mxu0 %v960_v13 }
  0x7a   : > { %859 = vmatpush3.bf16.msra.mxu1 %v977_v37  ;;  %p1089_p12 = por %p1088_p9, %p1087_p5 }
  0x7b   : > { %860 = vmatprep.subr.bf16.mxu1 %v978_v38 }
  0x7c   : > { %471 = vmatpush1.bf16.msra.mxu0 %v962_v14  ;;  %p1090_p2 = pnand %p1089_p12, %p1083_p3 }
  0x7d   : > { %472 = vmatprep.subr.bf16.mxu0 %v963_v15 }
  0x7e   : > { %861 = vmatpush3.bf16.msra.mxu1 %v979_v39 }
  0x7f   : > { %862 = vmatprep.subr.bf16.mxu1 %v980_v40 }
  0x80   : > { %473 = vmatpush1.bf16.msra.mxu0 %v965_v17 }
  0x81   : > { %474 = vmatprep.subr.bf16.mxu0 %v966_v18 }
  0x82   : > { %863 = vmatpush3.bf16.msra.mxu1 %v981_v41 }
  0x83   : > { %864 = vmatprep.subr.bf16.mxu1 %v982_v42 }
  0x84   : > { %475 = vmatpush1.bf16.msra.mxu0 %v968_v19  ;;  %v833_v19 = vld [vmem:[%s1457_s6] ss:$0 sm:$0xff] }
  0x85   : > { %476 = vmatprep.subr.bf16.mxu0 %v969_v20 }
  0x86   : > { %865 = vmatpush3.bf16.msra.mxu1 %v983_v43 }
  0x87   : > { %866 = vmatprep.subr.bf16.mxu1 %v984_v44 }
  0x88   : > { %477 = vmatpush1.bf16.msra.mxu0 %v971_v21 }
  0x8a   : > { %867 = vmatpush3.bf16.msra.mxu1 %v985_v45 }
  0x8b   : > { %868 = vmatprep.subr.bf16.mxu1 %v986_v46 }
  0x8e   : > { %869 = vmatpush3.bf16.msra.mxu1 %v987_v47 }
  0xf8   : > { %v326_v6 = vpop.xlane.xlu0 %325 }
  0xf9   : > { %v328_v7 = vmul.f32 0.0078125, %v326_v6 }
  0xfb   : > { %v329_v8 = vsub.f32 %v1384_v0, %v328_v7 }
  0xfd   : > { %v330_v9 = vmul.f32 %v329_v8, %v329_v8 }
  0xff   : > { %331 = vadd.xlane.f32.xlu0 %v330_v9 }
 0x18c   : > { %v332_v22 = vpop.xlane.xlu0 %331 }
 0x18d   : > { %v333_v23 = vmul.f32 0.0078125, %v332_v22 }
 0x18f   : > { %v334_v24 = vadd.f32 1e-05, %v333_v23 }
 0x191   : > { %988 = vrsqrt.f32 %v334_v24 }
 0x19b   : > { %v989_v25 = vpop.eup %988 }
 0x19c   : > { %v336_v27 = vmul.f32 %v989_v25, %v329_v8 }
 0x19e   : > { %v344_v29 = vmul.f32 %v815_v26, %v336_v27 }
 0x1a0   : > { %v352_v30 = vadd.f32 %v816_v28, %v344_v29 }
 0x1a2   : > { %v353_v31 = vpack.c.bf16 %v352_v30, %v352_v30 }
 0x1a4   : > { %495 = vmatmul.mubr.bf16.vlgmr.msra.gmra.mrb[0].mxu0 %v353_v31 }
 0x277   : > { %v496_v55 = vpop.f32.mrb[0].mxu0 }
 0x278   : > { %v497_v56 = vadd.f32 %v496_v55, %v375_v53  ;;  %v498_v57 = vpop.f32.mrb[1].mxu0 }
 0x279   : > { %v499_v58 = vadd.f32 %v498_v57, %v379_v54  ;;  %v500_v59 = vpop.f32.mrb[2].mxu0 }
 0x27a   : > { %v503_v60 = vmul.f32 %v497_v56, %v497_v56  ;;  %v501_v61 = vpop.f32.mrb[3].mxu0 }
 0x27b   : > { %v504_v62 = vmul.f32 %v499_v58, %v499_v58 }
 0x27c   : > { %v505_v63 = vmul.f32 %v503_v60, %v497_v56 }
 0x27d   : > { %v506_v1 = vmul.f32 %v504_v62, %v499_v58 }
 0x27e   : > { %v507_v2 = vmul.f32 0.044715, %v505_v63 }
 0x27f   : > { %v508_v3 = vmul.f32 0.044715, %v506_v1 }
 0x280   : > { %v509_v4 = vadd.f32 %v507_v2, %v497_v56 }
 0x281   : > { %v510_v5 = vadd.f32 %v508_v3, %v499_v58 }
 0x282   : > { %v511_v6 = vmul.f32 0.7978846, %v509_v4 }
 0x283   : > { %v512_v7 = vmul.f32 0.7978846, %v510_v5 }
 0x284   : > { %990 = vtanh.f32 %v511_v6 }
 0x285   : > { %992 = vtanh.f32 %v512_v7 }
 0x28e   : > { %v991_v8 = vpop.eup %990 }
 0x28f   : > { %v993_v9 = vpop.eup %992  ;;  %v515_v10 = vadd.f32 1.0, %v991_v8 }
 0x290   : > { %v516_v11 = vadd.f32 1.0, %v993_v9 }
 0x291   : > { %v517_v12 = vmul.f32 0.5, %v515_v10 }
 0x292   : > { %v518_v13 = vmul.f32 0.5, %v516_v11 }
 0x293   : > { %v519_v14 = vmul.f32 %v517_v12, %v497_v56 }
 0x294   : > { %v520_v15 = vmul.f32 %v518_v13, %v499_v58 }
 0x295   : > { %v521_v17 = vpack.c.bf16 %v519_v14, %v519_v14 }
 0x296   : > { %v522_v16 = vpack.c.bf16 %v520_v15, %v520_v15 }
 0x298   : > { %690 = vmatprep.mubr.bf16.mxu1 %v522_v16 }
 0x299   : > { %691 = vmatmul.mubr.bf16.vlgmr.msra.gmra.mrb[0].mxu1 %v521_v17 }
 0x36c   : > { %v870_v18 = vpop.f32.mrb[0].mxu1 }
 0x36d   : > { %v871_v20 = vpop.f32.mrb[1].mxu1 }
 0x36e   : > { %v872_v21 = vadd.f32 %v871_v20, %v870_v18  ;;  %v873_v22 = vpop.f32.mrb[2].mxu1 }
 0x36f   : > { %v874_v23 = vpop.f32.mrb[3].mxu1 }
 0x370   : > { %v693_v24 = vadd.f32 %v872_v21, %v833_v19 }
 0x372   : > { %v698_v25 = vadd.f32 %v693_v24, %v1384_v0 }
 0x374   : > { %699 = vst [vmem:[%s322_s19] sm:$0xff] %v698_v25 }
 0x375   : > { %1093 = shalt.err (!%p1090_p2)
}
 0x376   : > { %s1094_s15 = scalar_lea.hbm %s1407_s9, 128  ;;  %s1098_s22 = scalar_lea.hbm %s1458_s7, 256 }
 0x377   : > { %p1095_p13 = scmp.ne.s32.totalorder %s1407_s9, %s1094_s15  ;;  %p1099_p4 = scmp.lt.u32.totalorder %s1407_s9, %s1458_s7 }
 0x378   : > { %p1100_p7 = scmp.lt.u32.totalorder %s1098_s22, %s1094_s15  ;;  %p1102_p11 = scmp.lt.u32.totalorder %s1094_s15, %s1407_s9 }
 0x379   : > { %p1096_p6 = pnand %p1095_p13, %p1472_p0 }
 0x37a   : > { %p1101_p8 = por %p1100_p7, %p1099_p4 }
 0x37b   : > { %p1097_p10 = pneg %p1096_p6 }
 0x37c   : > { %p1103_p1 = por %p1102_p11, %p1101_p8 }
 0x37e   : > { %p1104_p3 = pnand %p1103_p1, %p1097_p10 }
 0x380   : > { %1107 = shalt.err (!%p1104_p3)
}
 0x381   : > { %886 = dma.vmem_to_hbm [thread:$0]  (%p1472_p0), %s1409_s20, 128, %s1407_s9, %s701_s11  }
 0x382 PF: > { %s726_s21 = sand.u32 1, %s1138_s24   ;;  %p1473_p5 = scmp.ne.s32.totalorder %s1463_s8, 0 }
 0x383   : > { %p1474_p9 = scmp.ge.s32.totalorder %s1150_s27, 2  ;;  %s727_s30 = scalar_lea.sflag [#allocation4], %s726_s21 }
 0x385   : > { %p900_p12 = pnand %p1474_p9, %p1473_p5 }
 0x387   : > { %1133 = dma.done.wait (!%p900_p12), %s727_s30, 128  }
 0x388   : > { %1135 = vsyncadd (!%p900_p12), %s727_s30, 4294967168  ;;  %p21_p2 = scmp.ge.s32.totalorder %s1311_s13, 4   ;;  %s1475_s24 = smov %s1142_s25 }
 0x389   : > { %s1476_s25 = smov %s1146_s26  ;;  %s1477_s26 = smov %s1320_s17 }
 0x38a   : > { %s1478_s27 = smov %s1311_s13  ;;  %23 = sbr.rel (!%p21_p2) target bundleno = 6 (0x6), region = 101 }
 0x391   :  { %732 = vsyncpa [#allocation3], 1 }
 0x392   :  { %734 = vsyncpa [#allocation3 + $0x1], 1 }
 0x393   :  { %735 = vsyncpa [#allocation6], 1 }
 0x394   :  { %736 = vsyncpa [#allocation4], 1 }
 0x395   :  { %738 = vsyncpa [#allocation4 + $0x1], 1 }

</bundles_post_ra>
